<compile_context>
chip_gen: v6e
topology: v6e:2x2x1
jax: 0.10.0
libtpu: 0.0.40
codegen_flags: <defaults>
</compile_context>

<pallas_src>
import functools

import numpy as np

import jax
import jax.numpy as jnp
from jax.experimental import pallas as pl
from jax.experimental.pallas import tpu as pltpu


_RESIDENT_VMEM_BUDGET = 12 * 1024 * 1024  # conservative: fits default scoped VMEM everywhere


def _round_up(x, m):
    return (x + m - 1) // m * m


def _cdiv(a, b):
    return (a + b - 1) // b


def _balanced_tile(dim, max_tile, granularity):
    """Largest tile <= max_tile (rounded to `granularity`) that splits `dim`
    into near-equal chunks, minimizing padding."""
    dim_r = _round_up(max(dim, 1), granularity)
    if dim_r <= max_tile:
        return dim_r
    n_tiles = _cdiv(dim_r, max_tile)
    return _round_up(_cdiv(dim_r, n_tiles), granularity)


def _apply_activation(y, activation):
    if activation == "sigmoid":
        # sigmoid(y) == 0.5 * (1 + tanh(y/2)): tanh runs on the EUP slot,
        # no VALU divide, numerically stable for large |y|.
        return 0.5 * (jnp.tanh(0.5 * y) + 1.0)
    return jnp.maximum(y, 0.0)  # relu


# --------------------------------------------------------------------------
# Kernels
# --------------------------------------------------------------------------
def _linear_act_resident_kernel(x_ref, w_ref, b_ref, o_ref, *, activation):
    # x_ref: [tb, Kp], w_ref: [Kp, Np] (constant block -> DMA'd once),
    # b_ref: [1, Np] f32, o_ref: [tb, Np]
    y = jnp.dot(x_ref[...], w_ref[...], preferred_element_type=jnp.float32)
    y = y + b_ref[...]
    o_ref[...] = _apply_activation(y, activation).astype(o_ref.dtype)


def _linear_act_tiled_kernel(x_ref, w_ref, b_ref, o_ref, *scratch, activation):
    # x_ref: [tb, tk], w_ref: [tk, tn], b_ref: [1, tn], o_ref: [tb, tn]
    # scratch: optional f32 [tb, tn] accumulator; when the output dtype is f32
    # we accumulate directly into o_ref (resident across the K grid axis).
    acc_ref = scratch[0] if scratch else o_ref
    k = pl.program_id(2)

    @pl.when(k == 0)
    def _():
        acc_ref[...] = jnp.zeros_like(acc_ref)

    acc_ref[...] += jnp.dot(
        x_ref[...], w_ref[...], preferred_element_type=jnp.float32
    )

    @pl.when(k == pl.num_programs(2) - 1)
    def _():
        y = acc_ref[...] + b_ref[...]
        o_ref[...] = _apply_activation(y, activation).astype(o_ref.dtype)


# --------------------------------------------------------------------------
# Wrapper
# --------------------------------------------------------------------------
@functools.partial(
    jax.jit,
    static_argnames=(
        "block_b", "block_n", "block_k", "compute_dtype", "activation",
        "vmem_limit_bytes", "weight_resident",
    ),
)
def linear_w_activation(
    x, w_t, b, *,
    block_b=512, block_n=512, block_k=1024,
    compute_dtype=jnp.bfloat16,
    activation="sigmoid",
    vmem_limit_bytes=None,
    weight_resident=None,
):
    """y = act(x @ w_t + b)   (== torch nn.Linear followed by Sigmoid/ReLU).

    x:   [B, in_features]
    w_t: [in_features, out_features]   (transpose of torch's weight)
    b:   [out_features]
    compute_dtype: streaming dtype for x / w_t (default bf16; f32 accumulate).
    weight_resident: None -> auto (keep W fully resident in VMEM if it fits).
    """
    B, in_f = x.shape
    assert w_t.shape[0] == in_f
    out_f = w_t.shape[1]
    out_dtype = x.dtype

    cdtype = np.dtype(compute_dtype) if compute_dtype is not None else np.dtype(x.dtype)
    if x.dtype != cdtype:
        x = x.astype(cdtype)
    if w_t.dtype != cdtype:
        w_t = w_t.astype(cdtype)
    b = b.astype(jnp.float32)

    cbytes = cdtype.itemsize
    obytes = np.dtype(out_dtype).itemsize
    sub = max(8, 32 // cbytes)          # sublane packing: 8 f32, 16 bf16, 32 int8/fp8

    def _cp(semantics):
        kw = dict(dimension_semantics=semantics)
        if vmem_limit_bytes is not None:
            kw["vmem_limit_bytes"] = vmem_limit_bytes
        return pltpu.CompilerParams(**kw)

    # Batch tile (balanced so ragged B isn't padded up to a full block_b multiple).
    tb = _balanced_tile(B, block_b, sub)
    Bp = _round_up(B, tb)

    # ------------------------------------------------------------------
    # Schedule choice: keep W resident in VMEM when it fits.
    # ------------------------------------------------------------------
    Kp_min = _round_up(in_f, 128)
    Np_min = _round_up(out_f, 128)
    resident_cost = (
        2 * Kp_min * Np_min * cbytes          # W (possibly double-buffered)
        + 2 * tb * Kp_min * cbytes            # x tiles, double-buffered
        + 2 * tb * Np_min * obytes            # out tiles, double-buffered
        + tb * Np_min * 4                     # f32 matmul result
        + Np_min * 4                          # bias
    )
    use_resident = (
        weight_resident
        if weight_resident is not None
        else resident_cost <= _RESIDENT_VMEM_BUDGET
    )

    if use_resident:
        # ---------------- weight-resident schedule ----------------
        Kp, Np = Kp_min, Np_min
        if (Bp, Kp) != (B, in_f):
            x = jnp.pad(x, ((0, Bp - B), (0, Kp - in_f)))   # K zero-fill required
        if (Kp, Np) != (in_f, out_f):
            w_t = jnp.pad(w_t, ((0, Kp - in_f), (0, Np - out_f)))
        b2d = (jnp.pad(b, (0, Np - out_f)) if Np != out_f else b).reshape(1, Np)

        cost = pl.CostEstimate(
            flops=2 * Bp * Kp * Np,
            transcendentals=Bp * Np if activation == "sigmoid" else 0,
            bytes_accessed=(Bp * Kp * cbytes + Kp * Np * cbytes
                            + Np * 4 + Bp * Np * obytes),
        )
        out_p = pl.pallas_call(
            functools.partial(_linear_act_resident_kernel, activation=activation),
            out_shape=jax.ShapeDtypeStruct((Bp, Np), out_dtype),
            grid_spec=pltpu.PrefetchScalarGridSpec(
                num_scalar_prefetch=0,
                grid=(Bp // tb,),
                in_specs=[
                    pl.BlockSpec((tb, Kp), lambda i: (i, 0)),   # x tile
                    pl.BlockSpec((Kp, Np), lambda i: (0, 0)),   # W: DMA'd once, stays resident
                    pl.BlockSpec((1, Np), lambda i: (0, 0)),    # bias
                ],
                out_specs=pl.BlockSpec((tb, Np), lambda i: (i, 0)),
            ),
            compiler_params=_cp(("parallel",)),
            cost_estimate=cost,
        )(x, w_t, b2d)
    else:
        # ---------------- general tiled 3-D schedule ----------------
        tn = _balanced_tile(out_f, block_n, 128)
        tk = _balanced_tile(in_f, block_k, 128)
        Np = _round_up(out_f, tn)
        Kp = _round_up(in_f, tk)

        # v7x megacore: make sure there are >= 2 parallel tiles when possible.
        if (Bp // tb) * (Np // tn) < 2 and Np % 256 == 0:
            tn = Np // 2

        if (Bp, Kp) != (B, in_f):
            x = jnp.pad(x, ((0, Bp - B), (0, Kp - in_f)))   # K zero-fill required
        if (Kp, Np) != (in_f, out_f):
            w_t = jnp.pad(w_t, ((0, Kp - in_f), (0, Np - out_f)))
        b2d = (jnp.pad(b, (0, Np - out_f)) if Np != out_f else b).reshape(1, Np)

        grid = (Bp // tb, Np // tn, Kp // tk)

        # f32 output -> accumulate directly in the resident output block.
        acc_in_out = np.dtype(out_dtype) == np.dtype(jnp.float32)
        scratch = [] if acc_in_out else [pltpu.VMEM((tb, tn), jnp.float32)]

        # Honest HBM traffic: W is re-read per batch tile, x per N tile.
        bytes_accessed = (
            (Np // tn) * Bp * Kp * cbytes
            + (Bp // tb) * Kp * Np * cbytes
            + Np * 4
            + Bp * Np * obytes
        )
        cost = pl.CostEstimate(
            flops=2 * Bp * Kp * Np,
            transcendentals=Bp * Np if activation == "sigmoid" else 0,
            bytes_accessed=bytes_accessed,
        )
        out_p = pl.pallas_call(
            functools.partial(_linear_act_tiled_kernel, activation=activation),
            out_shape=jax.ShapeDtypeStruct((Bp, Np), out_dtype),
            grid_spec=pltpu.PrefetchScalarGridSpec(
                num_scalar_prefetch=0,
                grid=grid,
                in_specs=[
                    pl.BlockSpec((tb, tk), lambda i, j, k: (i, k)),   # x tile
                    pl.BlockSpec((tk, tn), lambda i, j, k: (k, j)),   # W tile
                    pl.BlockSpec((1, tn), lambda i, j, k: (0, j)),    # bias tile
                ],
                out_specs=pl.BlockSpec((tb, tn), lambda i, j, k: (i, j)),
                scratch_shapes=scratch,
            ),
            compiler_params=_cp(("parallel", "parallel", "arbitrary")),
            cost_estimate=cost,
        )(x, w_t, b2d)

    if (Bp, Np) != (B, out_f):
        out_p = out_p[:B, :out_f]
    return out_p


# --------------------------------------------------------------------------
# Self-test
# --------------------------------------------------------------------------
if __name__ == "__main__":
    key = jax.random.PRNGKey(0)
    ks = jax.random.split(key, 9)

    def torch_like_params(kw, kb, in_f, out_f):
        bound = 1.0 / (in_f ** 0.5)
        w = jax.random.uniform(kw, (out_f, in_f), jnp.float32, -bound, bound)  # torch [out, in]
        bias = jax.random.uniform(kb, (out_f,), jnp.float32, -bound, bound)
        return w, bias

    # --- Case 1: f32 compute path, small aligned shapes (weight-resident) ---
    B1, IN1, OUT1 = 8, 32, 32
    w1, b1 = torch_like_params(ks[0], ks[1], IN1, OUT1)
    x1 = jax.random.normal(ks[2], (B1, IN1), jnp.float32)
    y1 = linear_w_activation(x1, w1.T, b1, compute_dtype=jnp.float32)
    jax.block_until_ready(y1)
    y1_ref = jax.nn.sigmoid(x1 @ w1.T + b1)
    assert y1.shape == (B1, OUT1)
    assert jnp.allclose(y1, y1_ref, atol=1e-4, rtol=1e-4)

    # --- Case 2: default bf16 streaming, ragged shapes (exercises padding) ---
    B2, IN2, OUT2 = 20, 48, 40
    w2, b2 = torch_like_params(ks[3], ks[4], IN2, OUT2)
    x2 = jax.random.normal(ks[5], (B2, IN2), jnp.float32)
    y2 = linear_w_activation(x2, w2.T, b2)                       # bf16 default, sigmoid
    jax.block_until_ready(y2)
    y2_ref = jax.nn.sigmoid(x2 @ w2.T + b2)
    assert y2.shape == (B2, OUT2)
    assert jnp.allclose(y2, y2_ref, atol=2e-2, rtol=2e-2)

    y2r = linear_w_activation(x2, w2.T, b2, activation="relu")   # ReLU variant
    jax.block_until_ready(y2r)
    y2r_ref = jnp.maximum(x2 @ w2.T + b2, 0.0)
    assert jnp.allclose(y2r, y2r_ref, atol=2e-2, rtol=2e-2)

    # --- Case 3: force the general tiled 3-D schedule (multi-tile grid,
    #             f32 output accumulated directly in o_ref, bf16 streaming) ---
    B3, IN3, OUT3 = 128, 384, 256
    w3, b3 = torch_like_params(ks[6], ks[7], IN3, OUT3)
    x3 = jax.random.normal(ks[8], (B3, IN3), jnp.float32)
    y3 = linear_w_activation(
        x3, w3.T, b3, block_b=64, block_n=128, block_k=128, weight_resident=False,
    )
    jax.block_until_ready(y3)
    y3_ref = jax.nn.sigmoid(x3 @ w3.T + b3)
    assert y3.shape == (B3, OUT3)
    assert jnp.allclose(y3, y3_ref, atol=2e-2, rtol=2e-2)

    print("KERNEL_OK")
</pallas_src>

<mosaic_0001>
module attributes {stable_mosaic.version = 11 : i64} {
  func.func @_linear_act_resident_kernel(%arg0: i32, %arg1: memref<8x128xf32, #tpu.memory_space<vmem>>, %arg2: memref<128x128xf32, #tpu.memory_space<vmem>>, %arg3: memref<1x128xf32, #tpu.memory_space<vmem>>, %arg4: memref<8x128xf32, #tpu.memory_space<vmem>>) attributes {dimension_semantics = [#tpu.dimension_semantics<parallel>], iteration_bounds = array<i64: 1>, scalar_prefetch = 0 : i64, scratch_operands = 0 : i64, tpu.core_type = #tpu.core_type<tc>, window_params = [{transform_indices = @transform_0, window_bounds = array<i64: 8, 128>}, {pipeline_mode = #tpu.pipeline_mode<synchronous>, transform_indices = @transform_1, window_bounds = array<i64: 128, 128>}, {pipeline_mode = #tpu.pipeline_mode<synchronous>, transform_indices = @transform_2, window_bounds = array<i64: 1, 128>}, {transform_indices = @transform_3, window_bounds = array<i64: 8, 128>}]} {
    %c0 = arith.constant 0 : index
    %c0_0 = arith.constant 0 : index
    %0 = vector.load %arg1[%c0, %c0_0] : memref<8x128xf32, #tpu.memory_space<vmem>>, vector<8x128xf32>
    %c0_1 = arith.constant 0 : index
    %c0_2 = arith.constant 0 : index
    %1 = vector.load %arg2[%c0_1, %c0_2] : memref<128x128xf32, #tpu.memory_space<vmem>>, vector<128x128xf32>
    %cst = arith.constant dense<0.000000e+00> : vector<8x128xf32>
    %2 = tpu.matmul %0, %1, %cst {dimension_numbers = #tpu.dot_dimension_numbers<[1], [0], [0], [1], [0, 0, 1, 1], [], []>} : vector<8x128xf32>, vector<128x128xf32>, vector<8x128xf32> -> vector<8x128xf32>
    %c0_3 = arith.constant 0 : index
    %c0_4 = arith.constant 0 : index
    %3 = vector.load %arg3[%c0_3, %c0_4] : memref<1x128xf32, #tpu.memory_space<vmem>>, vector<1x128xf32>
    %4 = vector.broadcast %3 : vector<1x128xf32> to vector<8x128xf32>
    %5 = arith.addf %2, %4 : vector<8x128xf32>
    %cst_5 = arith.constant 5.000000e-01 : f32
    %6 = vector.broadcast %cst_5 : f32 to vector<8x128xf32>
    %7 = arith.mulf %6, %5 : vector<8x128xf32>
    %8 = math.tanh %7 : vector<8x128xf32>
    %cst_6 = arith.constant 1.000000e+00 : f32
    %9 = vector.broadcast %cst_6 : f32 to vector<8x128xf32>
    %10 = arith.addf %8, %9 : vector<8x128xf32>
    %cst_7 = arith.constant 5.000000e-01 : f32
    %11 = vector.broadcast %cst_7 : f32 to vector<8x128xf32>
    %12 = arith.mulf %11, %10 : vector<8x128xf32>
    %c0_8 = arith.constant 0 : index
    %c0_9 = arith.constant 0 : index
    %13 = vector.load %arg4[%c0_8, %c0_9] : memref<8x128xf32, #tpu.memory_space<vmem>>, vector<8x128xf32>
    tpu.vector_store %arg4[%c0_8, %c0_9], %12 {strides = array<i32>} : memref<8x128xf32, #tpu.memory_space<vmem>>, vector<8x128xf32>,
    return
  }
  func.func @transform_0(%arg0: i32) -> (i32, i32) {
    %c0_i32 = arith.constant 0 : i32
    %c0_i32_0 = arith.constant 0 : i32
    return %arg0, %c0_i32 : i32, i32
  }
  func.func @transform_1(%arg0: i32) -> (i32, i32) {
    %c0_i32 = arith.constant 0 : i32
    %c0_i32_0 = arith.constant 0 : i32
    %c0_i32_1 = arith.constant 0 : i32
    return %c0_i32, %c0_i32_0 : i32, i32
  }
  func.func @transform_2(%arg0: i32) -> (i32, i32) {
    %c0_i32 = arith.constant 0 : i32
    %c0_i32_0 = arith.constant 0 : i32
    %c0_i32_1 = arith.constant 0 : i32
    return %c0_i32, %c0_i32_0 : i32, i32
  }
  func.func @transform_3(%arg0: i32) -> (i32, i32) {
    %c0_i32 = arith.constant 0 : i32
    %c0_i32_0 = arith.constant 0 : i32
    return %arg0, %c0_i32 : i32, i32
  }
}

</mosaic_0001>

<bundles_post_ra>
// kernel: linear_w_activation.1
= control target key start
LH: loop header
LB: loop body
LE: loop exit
PB: predicated region body
PF: predicated region fallthrough
CT: control target
= control target key end

     0   :  { %v208_v1 = vmov 0.0   ;;  %vm209_vm0 = vmmov 0   ;;  %s288_s0 = inlined_call_operand.vmem [shape: f32[8,128], index: 0, kind: input, shape index: {}]   ;;  %s289_s1 = inlined_call_operand.vmem [shape: f32[128,128], index: 1, kind: input, shape index: {}]   ;;  %s290_s2 = inlined_call_operand.vmem [shape: f32[1,128], index: 2, kind: input, shape index: {}]   ;;  %s291_s3 = inlined_call_operand.hbm [shape: f32[8,128], index: 3, kind: output, shape index: {}]  }
   0x1   :  { %v31_v0 = vld [vmem:[%s289_s1 + $0x78] sm:$0xff]  ;;  %146 = vmatprep.subr.mxu0 %v208_v1  ;;  %v30_v2 = vld [vmem:[%s289_s1 + $0x70] sm:$0xff]  ;;  %178 = vmatprep.mubr.msk.f32.mxu0 %vm209_vm0, %v208_v1  ;;  %v29_v3 = vld [vmem:[%s289_s1 + $0x68] sm:$0xff] }
   0x2   :  { %147 = vmatpush3.msra.mxu0 %v31_v0  ;;  %v28_v4 = vld [vmem:[%s289_s1 + $0x60] sm:$0xff] }
   0x3   :  { %148 = vmatprep.subr.mxu0 %v208_v1 }
   0x4   :  { %149 = vmatpush3.msra.mxu0 %v30_v2 }
   0x5   :  { %150 = vmatprep.subr.mxu0 %v208_v1 }
   0x6   :  { %151 = vmatpush3.msra.mxu0 %v29_v3 }
   0x7   :  { %8 = vsyncpa [#allocation3], 0  ;;  %152 = vmatprep.subr.mxu0 %v208_v1  ;;  %v27_v5 = vld [vmem:[%s289_s1 + $0x58] sm:$0xff]  ;;  %v26_v6 = vld [vmem:[%s289_s1 + $0x50] sm:$0xff]  ;;  %s210_s21 = smov [#allocation2]  }
   0x8   :  { %153 = vmatpush3.msra.mxu0 %v28_v4  ;;  %v25_v7 = vld [vmem:[%s289_s1 + $0x48] sm:$0xff]  ;;  %v24_v8 = vld [vmem:[%s289_s1 + $0x40] sm:$0xff]  ;;  %v23_v9 = vld [vmem:[%s289_s1 + $0x38] sm:$0xff] }
   0x9   :  { %154 = vmatprep.subr.mxu0 %v208_v1  ;;  %v22_v10 = vld [vmem:[%s289_s1 + $0x30] sm:$0xff]  ;;  %v21_v11 = vld [vmem:[%s289_s1 + $0x28] sm:$0xff]  ;;  %v20_v12 = vld [vmem:[%s289_s1 + $0x20] sm:$0xff] }
   0xa   :  { %155 = vmatpush3.msra.mxu0 %v27_v5  ;;  %v19_v13 = vld [vmem:[%s289_s1 + $0x18] sm:$0xff]  ;;  %v18_v14 = vld [vmem:[%s289_s1 + $0x10] sm:$0xff]  ;;  %v17_v15 = vld [vmem:[%s289_s1 + $0x8] sm:$0xff] }
   0xb   :  { %156 = vmatprep.subr.mxu0 %v208_v1  ;;  %v16_v16 = vld [vmem:[%s289_s1] sm:$0xff]  ;;  %s120_s1 = sshll.u32 %s210_s21, 4  ;;  %s121_s1 = int_to_ptr.vmem [resolvable:$true] %s120_s1 }
   0xc   :  { %157 = vmatpush3.msra.mxu0 %v26_v6  ;;  %v15_v17 = vld [vmem:[%s288_s0] sm:$0xff]  ;;  %s186_s0 = scalar_lea.vmem %s121_s1, 128  ;;  %p191_p1 = scmp.lt.s32.totalorder %s121_s1, %s121_s1 }
   0xd   :  { %158 = vmatprep.subr.mxu0 %v208_v1  ;;  %v128_v18 = vld [vmem:[%s290_s2] ss:$0 sm:$0xff]  ;;  %p187_p0 = scmp.ne.s32.totalorder %s121_s1, %s186_s0  ;;  %p192_p2 = scmp.lt.s32.totalorder %s186_s0, %s186_s0 }
   0xe   :  { %159 = vmatpush3.msra.mxu0 %v25_v7 }
   0xf   :  { %160 = vmatprep.subr.mxu0 %v208_v1  ;;  %p193_p3 = por %p192_p2, %p191_p1 }
  0x10   :  { %161 = vmatpush3.msra.mxu0 %v24_v8 }
  0x11   :  { %162 = vmatprep.subr.mxu0 %v208_v1  ;;  %p194_p4 = pnand %p193_p3, %p187_p0 }
  0x12   :  { %163 = vmatpush3.msra.mxu0 %v23_v9 }
  0x13   :  { %164 = vmatprep.subr.mxu0 %v208_v1 }
  0x14   :  { %165 = vmatpush3.msra.mxu0 %v22_v10 }
  0x15   :  { %166 = vmatprep.subr.mxu0 %v208_v1 }
  0x16   :  { %167 = vmatpush3.msra.mxu0 %v21_v11 }
  0x17   :  { %168 = vmatprep.subr.mxu0 %v208_v1 }
  0x18   :  { %169 = vmatpush3.msra.mxu0 %v20_v12 }
  0x19   :  { %170 = vmatprep.subr.mxu0 %v208_v1 }
  0x1a   :  { %171 = vmatpush3.msra.mxu0 %v19_v13 }
  0x1b   :  { %172 = vmatprep.subr.mxu0 %v208_v1 }
  0x1c   :  { %173 = vmatpush3.msra.mxu0 %v18_v14 }
  0x1d   :  { %174 = vmatprep.subr.mxu0 %v208_v1 }
  0x1e   :  { %175 = vmatpush3.msra.mxu0 %v17_v15 }
  0x1f   :  { %176 = vmatprep.subr.mxu0 %v208_v1 }
  0x20   :  { %177 = vmatpush3.msra.mxu0 %v16_v16 }
  0x21   :  { %179 = vmatmul.mubr.f32.vlgmr.msra.gmra.mxu0 %v15_v17 }
  0xe1   :  { %v105_v19 = vpop.f32.mrf.mxu0 }
  0xe2   :  { %v106_v20 = vadd.f32 %v128_v18, %v105_v19 }
  0xe3   :  { %v180_v21 = vpop.f32.mrf.mxu0 }
  0xe4   :  { %v109_v22 = vmul.f32 0.5, %v106_v20 }
  0xe6   :  { %184 = vtanh.f32 %v109_v22 }
  0xf3   :  { %v185_v23 = vpop.eup %184 }
  0xf4   :  { %v111_v24 = vadd.f32 1.0, %v185_v23 }
  0xf6   :  { %v112_v25 = vmul.f32 0.5, %v111_v24 }
  0xf8   :  { %113 = vst [vmem:[#allocation2] sm:$0xff] %v112_v25 }
  0xf9   :  { %197 = shalt.err (!%p194_p4)
}
  0xfa   :  { %123 = dma.vmem_to_hbm [thread:$0]  %s121_s1, 128, %s291_s3, [#allocation3]  }
  0xfb   :  { %206 = dma.done.wait [#allocation3], 128  }
  0xfc   :  { %207 = vsyncadd [#allocation3], 4294967168 }
  0xfd   :  { %127 = vsyncpa [#allocation3], 1 }

</bundles_post_ra>
